<compile_context>
chip_gen: v6e
topology: v6e:2x2x1
jax: 0.10.0
libtpu: 0.0.40
codegen_flags: <defaults>
</compile_context>

<pallas_src>
import numpy as np
import jax
import jax.numpy as jnp
from jax import lax
from jax.experimental import pallas as pl
from jax.experimental.pallas import tpu as pltpu


# ---------------------------------------------------------------------------
# Kernel: conv-as-matmul -> +bias -> ReLU -> 2x2 maxpool (max of 4 aligned
# 128-lane groups) -> fc matmul -> +bias -> ReLU.
# ---------------------------------------------------------------------------
def _fused_kernel(x_ref, wc_ref, cb_ref, wf_ref, fb_ref, o_ref):
    # x:  (TB, 256)   flattened 16x16 image
    # wc: (256, 512)  conv weight as dense linear map, 4 pool-position groups of 128 lanes
    # cb: (1, 512)    conv bias broadcast row (zero in padded lanes)
    # wf: (128, 128)  fc1 weight, zero-padded (rows 96.., cols 2.. are zero)
    # fb: (1, 128)    fc1 bias, zero-padded
    # o:  (TB, 128)   lane-dense output; real result is [:, :2]
    a = jnp.dot(x_ref[...], wc_ref[...], preferred_element_type=jnp.float32)
    a = jnp.maximum(a + cb_ref[...], 0.0)
    # 2x2 max-pool: elementwise max of the 4 pool sub-position groups.
    pooled = jnp.maximum(jnp.maximum(a[:, 0:128], a[:, 128:256]),
                         jnp.maximum(a[:, 256:384], a[:, 384:512]))      # (TB, 128)
    y = jnp.dot(pooled, wf_ref[...], preferred_element_type=jnp.float32) + fb_ref[...]
    o_ref[...] = jnp.maximum(y, 0.0)


# ---------------------------------------------------------------------------
# Constant placement one-hots (trace-time numpy): P[si, pi, iy, ky] = 1 iff the
# unpadded input row iy == 4*pi + 2*si + ky - 2 (conv stride 2, pad 2, pool 2).
# Only the 8x8 pool-relevant conv outputs are generated (MaxPool2d(2,2) on the
# 9x9 conv map discards the last row/col, matching PyTorch).
# ---------------------------------------------------------------------------
_P = np.zeros((2, 4, 16, 3), np.float32)
for _s in range(2):
    for _p in range(4):
        for _k in range(3):
            _r = 4 * _p + 2 * _s + _k - 2
            if 0 <= _r < 16:
                _P[_s, _p, _r, _k] = 1.0


def _prep_weights(conv_w, conv_b, fc_w, fc_b):
    """Reformat module weights (constant-size work, independent of batch)."""
    P = jnp.asarray(_P)                                    # (2, 4, 16, 3)
    w = conv_w[:, 0]                                       # (6, 3, 3)
    # Wc[si, pi, iy, sj, pj, ix, c] = dense conv linear map restricted to the
    # pool-relevant 8x8 output positions.
    Wc = jnp.einsum('abyk,cdxl,ekl->abycdxe', P, P, w)     # (2,4,16,2,4,16,6)
    # rows = iy*16+ix ; cols = (group=si*2+sj, c*16 + pi*4 + pj)  [PyTorch flatten order]
    Wm = jnp.transpose(Wc, (2, 5, 0, 3, 6, 1, 4)).reshape(256, 4, 96)
    Wm = jnp.pad(Wm, ((0, 0), (0, 0), (0, 32))).reshape(256, 512)          # (256, 512)
    cb = jnp.tile(jnp.pad(jnp.repeat(conv_b, 16), (0, 32)), 4).reshape(1, 512)

    w_fc = jnp.pad(fc_w.T, ((0, 32), (0, 126)))            # (128, 128)
    fb = jnp.pad(fc_b, (0, 126)).reshape(1, 128)           # (1, 128)
    return Wm, cb, w_fc, fb


@jax.jit
def one_layer_model(x, conv_w, conv_b, fc_w, fc_b):
    """x: (B, 1, 16, 16) float32 NCHW.  Returns (B, 2) float32."""
    B = x.shape[0]
    assert x.shape[1:] == (1, 16, 16)

    w_big, cb, w_fc, fb = _prep_weights(conv_w, conv_b, fc_w, fc_b)

    xf = x.reshape(B, 256).astype(jnp.float32)

    # Batch tiling: one grid step at small B (block == full array, no pad);
    # parallel 256-row tiles for large B (multiple of (8,128), well inside VMEM).
    TB = 256
    if B <= TB:
        tb, bp = B, B
    else:
        tb = TB
        bp = (B + TB - 1) // TB * TB
        if bp != B:
            xf = jnp.pad(xf, ((0, bp - B), (0, 0)))

    out = pl.pallas_call(
        _fused_kernel,
        out_shape=jax.ShapeDtypeStruct((bp, 128), jnp.float32),
        grid=(bp // tb,),
        in_specs=[
            pl.BlockSpec((tb, 256), lambda i: (i, 0)),
            pl.BlockSpec((256, 512), lambda i: (0, 0)),
            pl.BlockSpec((1, 512), lambda i: (0, 0)),
            pl.BlockSpec((128, 128), lambda i: (0, 0)),
            pl.BlockSpec((1, 128), lambda i: (0, 0)),
        ],
        out_specs=pl.BlockSpec((tb, 128), lambda i: (i, 0)),
        compiler_params=pltpu.CompilerParams(
            dimension_semantics=("parallel",)),
    )(xf, w_big, cb, w_fc, fb)

    return out[:B, :2]


# ---------------------------------------------------------------------------
# Pure-JAX reference (verification only)
# ---------------------------------------------------------------------------
def _reference(x, conv_w, conv_b, fc_w, fc_b):
    conv = lax.conv_general_dilated(
        x, conv_w, window_strides=(2, 2), padding=((2, 2), (2, 2)),
        dimension_numbers=("NCHW", "OIHW", "NCHW"))
    conv = jnp.maximum(conv + conv_b[None, :, None, None], 0.0)
    pooled = lax.reduce_window(conv, -jnp.inf, lax.max,
                               (1, 1, 2, 2), (1, 1, 2, 2), "VALID")
    flat = pooled.reshape(x.shape[0], -1)
    return jnp.maximum(flat @ fc_w.T + fc_b[None, :], 0.0)


if __name__ == "__main__":
    key = jax.random.PRNGKey(0)
    k0, k1, k2, k3, k4 = jax.random.split(key, 5)

    B = 2
    x = jax.random.normal(k0, (B, 1, 16, 16), dtype=jnp.float32)

    # deterministic parameter init (shapes from the module __init__)
    conv_w = 0.1 * jax.random.normal(k1, (6, 1, 3, 3), dtype=jnp.float32)
    conv_b = 0.1 * jax.random.normal(k2, (6,), dtype=jnp.float32)
    fc_w = 0.1 * jax.random.normal(k3, (2, 96), dtype=jnp.float32)
    fc_b = 0.1 * jax.random.normal(k4, (2,), dtype=jnp.float32)

    out = jax.block_until_ready(one_layer_model(x, conv_w, conv_b, fc_w, fc_b))

    ref = _reference(x, conv_w, conv_b, fc_w, fc_b)
    np.testing.assert_allclose(np.asarray(out), np.asarray(ref), rtol=1e-4, atol=1e-4)

    print("KERNEL_OK")
</pallas_src>

<mosaic_0001>
module attributes {stable_mosaic.version = 11 : i64} {
  func.func @_fused_kernel(%arg0: i32, %arg1: memref<2x256xf32, #tpu.memory_space<vmem>>, %arg2: memref<256x512xf32, #tpu.memory_space<vmem>>, %arg3: memref<1x512xf32, #tpu.memory_space<vmem>>, %arg4: memref<128x128xf32, #tpu.memory_space<vmem>>, %arg5: memref<1x128xf32, #tpu.memory_space<vmem>>, %arg6: memref<2x128xf32, #tpu.memory_space<vmem>>) attributes {dimension_semantics = [#tpu.dimension_semantics<parallel>], iteration_bounds = array<i64: 1>, scalar_prefetch = 0 : i64, scratch_operands = 0 : i64, tpu.core_type = #tpu.core_type<tc>, window_params = [{transform_indices = @transform_0, window_bounds = array<i64: 2, 256>}, {pipeline_mode = #tpu.pipeline_mode<synchronous>, transform_indices = @transform_1, window_bounds = array<i64: 256, 512>}, {pipeline_mode = #tpu.pipeline_mode<synchronous>, transform_indices = @transform_2, window_bounds = array<i64: 1, 512>}, {pipeline_mode = #tpu.pipeline_mode<synchronous>, transform_indices = @transform_3, window_bounds = array<i64: 128, 128>}, {pipeline_mode = #tpu.pipeline_mode<synchronous>, transform_indices = @transform_4, window_bounds = array<i64: 1, 128>}, {transform_indices = @transform_5, window_bounds = array<i64: 2, 128>}]} {
    %c0 = arith.constant 0 : index
    %c0_0 = arith.constant 0 : index
    %0 = vector.load %arg1[%c0, %c0_0] : memref<2x256xf32, #tpu.memory_space<vmem>>, vector<2x256xf32>
    %c0_1 = arith.constant 0 : index
    %c0_2 = arith.constant 0 : index
    %1 = vector.load %arg2[%c0_1, %c0_2] : memref<256x512xf32, #tpu.memory_space<vmem>>, vector<256x512xf32>
    %cst = arith.constant dense<0.000000e+00> : vector<2x512xf32>
    %2 = tpu.matmul %0, %1, %cst {dimension_numbers = #tpu.dot_dimension_numbers<[1], [0], [0], [1], [0, 0, 1, 1], [], []>} : vector<2x256xf32>, vector<256x512xf32>, vector<2x512xf32> -> vector<2x512xf32>
    %c0_3 = arith.constant 0 : index
    %c0_4 = arith.constant 0 : index
    %3 = vector.load %arg3[%c0_3, %c0_4] : memref<1x512xf32, #tpu.memory_space<vmem>>, vector<1x512xf32>
    %4 = vector.broadcast %3 : vector<1x512xf32> to vector<2x512xf32>
    %5 = arith.addf %2, %4 : vector<2x512xf32>
    %cst_5 = arith.constant 0.000000e+00 : f32
    %6 = vector.broadcast %cst_5 : f32 to vector<2x512xf32>
    %7 = arith.maximumf %5, %6 : vector<2x512xf32>
    %8 = vector.extract_strided_slice %7 {offsets = [0, 0], sizes = [2, 128], strides = [1, 1]} : vector<2x512xf32> to vector<2x128xf32>
    %9 = vector.extract_strided_slice %7 {offsets = [0, 128], sizes = [2, 128], strides = [1, 1]} : vector<2x512xf32> to vector<2x128xf32>
    %10 = arith.maximumf %8, %9 : vector<2x128xf32>
    %11 = vector.extract_strided_slice %7 {offsets = [0, 256], sizes = [2, 128], strides = [1, 1]} : vector<2x512xf32> to vector<2x128xf32>
    %12 = vector.extract_strided_slice %7 {offsets = [0, 384], sizes = [2, 128], strides = [1, 1]} : vector<2x512xf32> to vector<2x128xf32>
    %13 = arith.maximumf %11, %12 : vector<2x128xf32>
    %14 = arith.maximumf %10, %13 : vector<2x128xf32>
    %c0_6 = arith.constant 0 : index
    %c0_7 = arith.constant 0 : index
    %15 = vector.load %arg4[%c0_6, %c0_7] : memref<128x128xf32, #tpu.memory_space<vmem>>, vector<128x128xf32>
    %cst_8 = arith.constant dense<0.000000e+00> : vector<2x128xf32>
    %16 = tpu.matmul %14, %15, %cst_8 {dimension_numbers = #tpu.dot_dimension_numbers<[1], [0], [0], [1], [0, 0, 1, 1], [], []>} : vector<2x128xf32>, vector<128x128xf32>, vector<2x128xf32> -> vector<2x128xf32>
    %c0_9 = arith.constant 0 : index
    %c0_10 = arith.constant 0 : index
    %17 = vector.load %arg5[%c0_9, %c0_10] : memref<1x128xf32, #tpu.memory_space<vmem>>, vector<1x128xf32>
    %18 = vector.broadcast %17 : vector<1x128xf32> to vector<2x128xf32>
    %19 = arith.addf %16, %18 : vector<2x128xf32>
    %cst_11 = arith.constant 0.000000e+00 : f32
    %20 = vector.broadcast %cst_11 : f32 to vector<2x128xf32>
    %21 = arith.maximumf %19, %20 : vector<2x128xf32>
    %c0_12 = arith.constant 0 : index
    %c0_13 = arith.constant 0 : index
    %22 = vector.load %arg6[%c0_12, %c0_13] : memref<2x128xf32, #tpu.memory_space<vmem>>, vector<2x128xf32>
    tpu.vector_store %arg6[%c0_12, %c0_13], %21 {strides = array<i32>} : memref<2x128xf32, #tpu.memory_space<vmem>>, vector<2x128xf32>,
    return
  }
  func.func @transform_0(%arg0: i32) -> (i32, i32) {
    %c0_i32 = arith.constant 0 : i32
    %c0_i32_0 = arith.constant 0 : i32
    return %arg0, %c0_i32 : i32, i32
  }
  func.func @transform_1(%arg0: i32) -> (i32, i32) {
    %c0_i32 = arith.constant 0 : i32
    %c0_i32_0 = arith.constant 0 : i32
    %c0_i32_1 = arith.constant 0 : i32
    return %c0_i32, %c0_i32_0 : i32, i32
  }
  func.func @transform_2(%arg0: i32) -> (i32, i32) {
    %c0_i32 = arith.constant 0 : i32
    %c0_i32_0 = arith.constant 0 : i32
    %c0_i32_1 = arith.constant 0 : i32
    return %c0_i32, %c0_i32_0 : i32, i32
  }
  func.func @transform_3(%arg0: i32) -> (i32, i32) {
    %c0_i32 = arith.constant 0 : i32
    %c0_i32_0 = arith.constant 0 : i32
    %c0_i32_1 = arith.constant 0 : i32
    return %c0_i32, %c0_i32_0 : i32, i32
  }
  func.func @transform_4(%arg0: i32) -> (i32, i32) {
    %c0_i32 = arith.constant 0 : i32
    %c0_i32_0 = arith.constant 0 : i32
    %c0_i32_1 = arith.constant 0 : i32
    return %c0_i32, %c0_i32_0 : i32, i32
  }
  func.func @transform_5(%arg0: i32) -> (i32, i32) {
    %c0_i32 = arith.constant 0 : i32
    %c0_i32_0 = arith.constant 0 : i32
    return %arg0, %c0_i32 : i32, i32
  }
}

</mosaic_0001>

<bundles_post_ra>
// kernel: tile.8
= control target key start
LH: loop header
LB: loop body
LE: loop exit
PB: predicated region body
PF: predicated region fallthrough
CT: control target
= control target key end

     0   :  { %s22_s0 = inlined_call_operand.vmem [shape: f32[128], index: 0, kind: input, shape index: {}]   ;;  %s23_s1 = inlined_call_operand.vmem [shape: f32[4,128], index: 1, kind: output, shape index: {}]  }
   0x1   :  { %v4_v0 = vld [vmem:[%s22_s0] ss:$0 sm:$0xff] }
   0x2   :  { %5 = vst [vmem:[%s23_s1] sm:$0xf] %v4_v0 }

// kernel: one_layer_model.1
= control target key start
LH: loop header
LB: loop body
LE: loop exit
PB: predicated region body
PF: predicated region fallthrough
CT: control target
= control target key end

     0   :  { %s997_s0 = inlined_call_operand.vmem [shape: f32[2,256], index: 0, kind: input, shape index: {}]   ;;  %s998_s1 = inlined_call_operand.vmem [shape: f32[256,512], index: 1, kind: input, shape index: {}]   ;;  %s999_s2 = inlined_call_operand.vmem [shape: f32[1,512], index: 2, kind: input, shape index: {}]   ;;  %s1000_s3 = inlined_call_operand.vmem [shape: f32[128,128], index: 3, kind: input, shape index: {}]   ;;  %s1001_s4 = inlined_call_operand.vmem [shape: f32[1,128], index: 4, kind: input, shape index: {}]   ;;  %s1002_s5 = inlined_call_operand.hbm [shape: f32[2,128], index: 5, kind: output, shape index: {}]  }
   0x1   :  { %v83_v0 = vld [vmem:[%s998_s1 + $0x1e8] sm:$0xff]  ;;  %v85_v1 = vld [vmem:[%s998_s1 + $0x1f8] sm:$0xff]  ;;  %v82_v2 = vld [vmem:[%s998_s1 + $0x1e0] sm:$0xff] }
   0x2   :  { %183 = vmatprep.subr.mxu0 %v83_v0  ;;  %254 = vmatprep.subr.mxu1 %v85_v1  ;;  %v84_v3 = vld [vmem:[%s998_s1 + $0x1f0] sm:$0xff]  ;;  %v79_v4 = vld [vmem:[%s998_s1 + $0x1c8] sm:$0xff]  ;;  %v81_v5 = vld [vmem:[%s998_s1 + $0x1d8] sm:$0xff] }
   0x3   :  { %184 = vmatpush1.msra.mxu0 %v82_v2  ;;  %255 = vmatpush1.msra.mxu1 %v84_v3  ;;  %v78_v6 = vld [vmem:[%s998_s1 + $0x1c0] sm:$0xff]  ;;  %v80_v7 = vld [vmem:[%s998_s1 + $0x1d0] sm:$0xff]  ;;  %v75_v8 = vld [vmem:[%s998_s1 + $0x1a8] sm:$0xff] }
   0x4   :  { %185 = vmatprep.subr.mxu0 %v79_v4  ;;  %256 = vmatprep.subr.mxu1 %v81_v5  ;;  %v77_v9 = vld [vmem:[%s998_s1 + $0x1b8] sm:$0xff]  ;;  %v74_v10 = vld [vmem:[%s998_s1 + $0x1a0] sm:$0xff]  ;;  %v76_v11 = vld [vmem:[%s998_s1 + $0x1b0] sm:$0xff] }
   0x5   :  { %186 = vmatpush1.msra.mxu0 %v78_v6  ;;  %257 = vmatpush1.msra.mxu1 %v80_v7  ;;  %v71_v12 = vld [vmem:[%s998_s1 + $0x188] sm:$0xff]  ;;  %v73_v13 = vld [vmem:[%s998_s1 + $0x198] sm:$0xff]  ;;  %v70_v14 = vld [vmem:[%s998_s1 + $0x180] sm:$0xff] }
   0x6   :  { %187 = vmatprep.subr.mxu0 %v75_v8  ;;  %258 = vmatprep.subr.mxu1 %v77_v9  ;;  %v72_v15 = vld [vmem:[%s998_s1 + $0x190] sm:$0xff]  ;;  %v67_v16 = vld [vmem:[%s998_s1 + $0x168] sm:$0xff]  ;;  %v69_v17 = vld [vmem:[%s998_s1 + $0x178] sm:$0xff] }
   0x7   :  { %188 = vmatpush1.msra.mxu0 %v74_v10  ;;  %259 = vmatpush1.msra.mxu1 %v76_v11  ;;  %v66_v18 = vld [vmem:[%s998_s1 + $0x160] sm:$0xff]  ;;  %v68_v19 = vld [vmem:[%s998_s1 + $0x170] sm:$0xff]  ;;  %v63_v20 = vld [vmem:[%s998_s1 + $0x148] sm:$0xff] }
   0x8   :  { %189 = vmatprep.subr.mxu0 %v71_v12  ;;  %260 = vmatprep.subr.mxu1 %v73_v13  ;;  %v65_v21 = vld [vmem:[%s998_s1 + $0x158] sm:$0xff]  ;;  %v62_v22 = vld [vmem:[%s998_s1 + $0x140] sm:$0xff]  ;;  %v64_v23 = vld [vmem:[%s998_s1 + $0x150] sm:$0xff] }
   0x9   :  { %190 = vmatpush1.msra.mxu0 %v70_v14  ;;  %261 = vmatpush1.msra.mxu1 %v72_v15  ;;  %v59_v24 = vld [vmem:[%s998_s1 + $0x128] sm:$0xff]  ;;  %v61_v25 = vld [vmem:[%s998_s1 + $0x138] sm:$0xff]  ;;  %v58_v26 = vld [vmem:[%s998_s1 + $0x120] sm:$0xff] }
   0xa   :  { %191 = vmatprep.subr.mxu0 %v67_v16  ;;  %262 = vmatprep.subr.mxu1 %v69_v17  ;;  %v60_v27 = vld [vmem:[%s998_s1 + $0x130] sm:$0xff]  ;;  %v55_v28 = vld [vmem:[%s998_s1 + $0x108] sm:$0xff]  ;;  %v57_v29 = vld [vmem:[%s998_s1 + $0x118] sm:$0xff] }
   0xb   :  { %192 = vmatpush1.msra.mxu0 %v66_v18  ;;  %263 = vmatpush1.msra.mxu1 %v68_v19  ;;  %v54_v30 = vld [vmem:[%s998_s1 + $0x100] sm:$0xff]  ;;  %v56_v31 = vld [vmem:[%s998_s1 + $0x110] sm:$0xff]  ;;  %v51_v32 = vld [vmem:[%s998_s1 + $0xe8] sm:$0xff] }
   0xc   :  { %193 = vmatprep.subr.mxu0 %v63_v20  ;;  %264 = vmatprep.subr.mxu1 %v65_v21  ;;  %v53_v33 = vld [vmem:[%s998_s1 + $0xf8] sm:$0xff]  ;;  %v50_v34 = vld [vmem:[%s998_s1 + $0xe0] sm:$0xff]  ;;  %v52_v35 = vld [vmem:[%s998_s1 + $0xf0] sm:$0xff] }
   0xd   :  { %194 = vmatpush1.msra.mxu0 %v62_v22  ;;  %265 = vmatpush1.msra.mxu1 %v64_v23  ;;  %v47_v36 = vld [vmem:[%s998_s1 + $0xc8] sm:$0xff]  ;;  %v49_v37 = vld [vmem:[%s998_s1 + $0xd8] sm:$0xff]  ;;  %v46_v38 = vld [vmem:[%s998_s1 + $0xc0] sm:$0xff] }
   0xe   :  { %195 = vmatprep.subr.mxu0 %v59_v24  ;;  %266 = vmatprep.subr.mxu1 %v61_v25  ;;  %v48_v39 = vld [vmem:[%s998_s1 + $0xd0] sm:$0xff]  ;;  %v43_v40 = vld [vmem:[%s998_s1 + $0xa8] sm:$0xff]  ;;  %v45_v41 = vld [vmem:[%s998_s1 + $0xb8] sm:$0xff] }
   0xf   :  { %196 = vmatpush1.msra.mxu0 %v58_v26  ;;  %267 = vmatpush1.msra.mxu1 %v60_v27  ;;  %v42_v42 = vld [vmem:[%s998_s1 + $0xa0] sm:$0xff]  ;;  %v44_v43 = vld [vmem:[%s998_s1 + $0xb0] sm:$0xff]  ;;  %v39_v44 = vld [vmem:[%s998_s1 + $0x88] sm:$0xff] }
  0x10   :  { %197 = vmatprep.subr.mxu0 %v55_v28  ;;  %268 = vmatprep.subr.mxu1 %v57_v29  ;;  %v41_v45 = vld [vmem:[%s998_s1 + $0x98] sm:$0xff]  ;;  %v38_v46 = vld [vmem:[%s998_s1 + $0x80] sm:$0xff]  ;;  %v40_v47 = vld [vmem:[%s998_s1 + $0x90] sm:$0xff] }
  0x11   :  { %198 = vmatpush1.msra.mxu0 %v54_v30  ;;  %269 = vmatpush1.msra.mxu1 %v56_v31  ;;  %v35_v48 = vld [vmem:[%s998_s1 + $0x68] sm:$0xff]  ;;  %v37_v49 = vld [vmem:[%s998_s1 + $0x78] sm:$0xff]  ;;  %v34_v50 = vld [vmem:[%s998_s1 + $0x60] sm:$0xff] }
  0x12   :  { %199 = vmatprep.subr.mxu0 %v51_v32  ;;  %270 = vmatprep.subr.mxu1 %v53_v33  ;;  %v36_v51 = vld [vmem:[%s998_s1 + $0x70] sm:$0xff]  ;;  %v31_v52 = vld [vmem:[%s998_s1 + $0x48] sm:$0xff]  ;;  %v33_v53 = vld [vmem:[%s998_s1 + $0x58] sm:$0xff] }
  0x13   :  { %200 = vmatpush1.msra.mxu0 %v50_v34  ;;  %271 = vmatpush1.msra.mxu1 %v52_v35  ;;  %v30_v54 = vld [vmem:[%s998_s1 + $0x40] sm:$0xff]  ;;  %v32_v55 = vld [vmem:[%s998_s1 + $0x50] sm:$0xff]  ;;  %v27_v56 = vld [vmem:[%s998_s1 + $0x28] sm:$0xff] }
  0x14   :  { %201 = vmatprep.subr.mxu0 %v47_v36  ;;  %272 = vmatprep.subr.mxu1 %v49_v37  ;;  %v29_v57 = vld [vmem:[%s998_s1 + $0x38] sm:$0xff]  ;;  %v26_v58 = vld [vmem:[%s998_s1 + $0x20] sm:$0xff]  ;;  %v28_v59 = vld [vmem:[%s998_s1 + $0x30] sm:$0xff] }
  0x15   :  { %202 = vmatpush1.msra.mxu0 %v46_v38  ;;  %273 = vmatpush1.msra.mxu1 %v48_v39  ;;  %v23_v60 = vld [vmem:[%s998_s1 + $0x8] sm:$0xff]  ;;  %v25_v61 = vld [vmem:[%s998_s1 + $0x18] sm:$0xff]  ;;  %v22_v62 = vld [vmem:[%s998_s1] sm:$0xff] }
  0x16   :  { %203 = vmatprep.subr.mxu0 %v43_v40  ;;  %274 = vmatprep.subr.mxu1 %v45_v41  ;;  %v24_v63 = vld [vmem:[%s998_s1 + $0x10] sm:$0xff]  ;;  %v147_v0 = vld [vmem:[%s998_s1 + $0x3e8] sm:$0xff]  ;;  %v149_v1 = vld [vmem:[%s998_s1 + $0x3f8] sm:$0xff] }
  0x17   :  { %204 = vmatpush1.msra.mxu0 %v42_v42  ;;  %275 = vmatpush1.msra.mxu1 %v44_v43  ;;  %v146_v2 = vld [vmem:[%s998_s1 + $0x3e0] sm:$0xff]  ;;  %v148_v3 = vld [vmem:[%s998_s1 + $0x3f0] sm:$0xff]  ;;  %v143_v4 = vld [vmem:[%s998_s1 + $0x3c8] sm:$0xff] }
  0x18   :  { %205 = vmatprep.subr.mxu0 %v39_v44  ;;  %276 = vmatprep.subr.mxu1 %v41_v45  ;;  %v145_v5 = vld [vmem:[%s998_s1 + $0x3d8] sm:$0xff]  ;;  %v142_v6 = vld [vmem:[%s998_s1 + $0x3c0] sm:$0xff]  ;;  %v144_v7 = vld [vmem:[%s998_s1 + $0x3d0] sm:$0xff] }
  0x19   :  { %206 = vmatpush1.msra.mxu0 %v38_v46  ;;  %277 = vmatpush1.msra.mxu1 %v40_v47  ;;  %v139_v8 = vld [vmem:[%s998_s1 + $0x3a8] sm:$0xff]  ;;  %v141_v9 = vld [vmem:[%s998_s1 + $0x3b8] sm:$0xff]  ;;  %v138_v10 = vld [vmem:[%s998_s1 + $0x3a0] sm:$0xff] }
  0x1a   :  { %207 = vmatprep.subr.mxu0 %v35_v48  ;;  %278 = vmatprep.subr.mxu1 %v37_v49  ;;  %v140_v11 = vld [vmem:[%s998_s1 + $0x3b0] sm:$0xff]  ;;  %v135_v12 = vld [vmem:[%s998_s1 + $0x388] sm:$0xff]  ;;  %v137_v13 = vld [vmem:[%s998_s1 + $0x398] sm:$0xff] }
  0x1b   :  { %208 = vmatpush1.msra.mxu0 %v34_v50  ;;  %279 = vmatpush1.msra.mxu1 %v36_v51  ;;  %v134_v14 = vld [vmem:[%s998_s1 + $0x380] sm:$0xff]  ;;  %v136_v15 = vld [vmem:[%s998_s1 + $0x390] sm:$0xff]  ;;  %v131_v16 = vld [vmem:[%s998_s1 + $0x368] sm:$0xff] }
  0x1c   :  { %209 = vmatprep.subr.mxu0 %v31_v52  ;;  %280 = vmatprep.subr.mxu1 %v33_v53  ;;  %v133_v17 = vld [vmem:[%s998_s1 + $0x378] sm:$0xff]  ;;  %v130_v18 = vld [vmem:[%s998_s1 + $0x360] sm:$0xff]  ;;  %v132_v19 = vld [vmem:[%s998_s1 + $0x370] sm:$0xff] }
  0x1d   :  { %210 = vmatpush1.msra.mxu0 %v30_v54  ;;  %281 = vmatpush1.msra.mxu1 %v32_v55  ;;  %v127_v20 = vld [vmem:[%s998_s1 + $0x348] sm:$0xff]  ;;  %v129_v21 = vld [vmem:[%s998_s1 + $0x358] sm:$0xff]  ;;  %v126_v22 = vld [vmem:[%s998_s1 + $0x340] sm:$0xff] }
  0x1e   :  { %211 = vmatprep.subr.mxu0 %v27_v56  ;;  %282 = vmatprep.subr.mxu1 %v29_v57  ;;  %v128_v23 = vld [vmem:[%s998_s1 + $0x350] sm:$0xff]  ;;  %v123_v24 = vld [vmem:[%s998_s1 + $0x328] sm:$0xff]  ;;  %v125_v25 = vld [vmem:[%s998_s1 + $0x338] sm:$0xff] }
  0x1f   :  { %212 = vmatpush1.msra.mxu0 %v26_v58  ;;  %283 = vmatpush1.msra.mxu1 %v28_v59  ;;  %v122_v26 = vld [vmem:[%s998_s1 + $0x320] sm:$0xff]  ;;  %v124_v27 = vld [vmem:[%s998_s1 + $0x330] sm:$0xff]  ;;  %v119_v28 = vld [vmem:[%s998_s1 + $0x308] sm:$0xff] }
  0x20   :  { %213 = vmatprep.subr.mxu0 %v23_v60  ;;  %284 = vmatprep.subr.mxu1 %v25_v61  ;;  %v121_v29 = vld [vmem:[%s998_s1 + $0x318] sm:$0xff]  ;;  %v118_v30 = vld [vmem:[%s998_s1 + $0x300] sm:$0xff]  ;;  %v120_v31 = vld [vmem:[%s998_s1 + $0x310] sm:$0xff] }
  0x21   :  { %214 = vmatpush1.msra.mxu0 %v22_v62  ;;  %285 = vmatpush1.msra.mxu1 %v24_v63  ;;  %v115_v32 = vld [vmem:[%s998_s1 + $0x2e8] sm:$0xff]  ;;  %v117_v33 = vld [vmem:[%s998_s1 + $0x2f8] sm:$0xff] }
  0x22   :  { %215 = vmatprep.subr.mxu0 %v147_v0  ;;  %286 = vmatprep.subr.mxu1 %v149_v1 }
  0x23   :  { %216 = vmatpush2.msra.mxu0 %v146_v2  ;;  %287 = vmatpush2.msra.mxu1 %v148_v3 }
  0x24   :  { %217 = vmatprep.subr.mxu0 %v143_v4  ;;  %288 = vmatprep.subr.mxu1 %v145_v5 }
  0x25   :  { %218 = vmatpush2.msra.mxu0 %v142_v6  ;;  %289 = vmatpush2.msra.mxu1 %v144_v7 }
  0x26   :  { %219 = vmatprep.subr.mxu0 %v139_v8  ;;  %290 = vmatprep.subr.mxu1 %v141_v9 }
  0x27   :  { %220 = vmatpush2.msra.mxu0 %v138_v10  ;;  %291 = vmatpush2.msra.mxu1 %v140_v11 }
  0x28   :  { %221 = vmatprep.subr.mxu0 %v135_v12  ;;  %292 = vmatprep.subr.mxu1 %v137_v13 }
  0x29   :  { %222 = vmatpush2.msra.mxu0 %v134_v14  ;;  %293 = vmatpush2.msra.mxu1 %v136_v15 }
  0x2a   :  { %223 = vmatprep.subr.mxu0 %v131_v16  ;;  %294 = vmatprep.subr.mxu1 %v133_v17 }
  0x2b   :  { %224 = vmatpush2.msra.mxu0 %v130_v18  ;;  %295 = vmatpush2.msra.mxu1 %v132_v19 }
  0x2c   :  { %225 = vmatprep.subr.mxu0 %v127_v20  ;;  %296 = vmatprep.subr.mxu1 %v129_v21 }
  0x2d   :  { %226 = vmatpush2.msra.mxu0 %v126_v22  ;;  %297 = vmatpush2.msra.mxu1 %v128_v23 }
  0x2e   :  { %227 = vmatprep.subr.mxu0 %v123_v24  ;;  %298 = vmatprep.subr.mxu1 %v125_v25 }
  0x2f   :  { %228 = vmatpush2.msra.mxu0 %v122_v26  ;;  %299 = vmatpush2.msra.mxu1 %v124_v27 }
  0x30   :  { %10 = vsyncpa [#allocation3], 0  ;;  %229 = vmatprep.subr.mxu0 %v119_v28  ;;  %300 = vmatprep.subr.mxu1 %v121_v29  ;;  %v114_v34 = vld [vmem:[%s998_s1 + $0x2e0] sm:$0xff]  ;;  %v116_v35 = vld [vmem:[%s998_s1 + $0x2f0] sm:$0xff]  ;;  %v520_v3 = vmov 0.0   ;;  %vm521_vm0 = vmmov 0   ;;  %v152_v19 = vlaneseq }
  0x31   :  { %230 = vmatpush2.msra.mxu0 %v118_v30  ;;  %301 = vmatpush2.msra.mxu1 %v120_v31  ;;  %v111_v36 = vld [vmem:[%s998_s1 + $0x2c8] sm:$0xff]  ;;  %v113_v37 = vld [vmem:[%s998_s1 + $0x2d8] sm:$0xff]  ;;  %v110_v38 = vld [vmem:[%s998_s1 + $0x2c0] sm:$0xff]  ;;  %s522_s6 = smov [#allocation2]  }
  0x32   :  { %231 = vmatprep.subr.mxu0 %v115_v32  ;;  %302 = vmatprep.subr.mxu1 %v117_v33  ;;  %v112_v39 = vld [vmem:[%s998_s1 + $0x2d0] sm:$0xff]  ;;  %v107_v40 = vld [vmem:[%s998_s1 + $0x2a8] sm:$0xff]  ;;  %v109_v41 = vld [vmem:[%s998_s1 + $0x2b8] sm:$0xff]  ;;  %v153_v20 = vshrl.u32 %v152_v19, 7  ;;  %s433_s7 = sshll.u32 %s522_s6, 4  ;;  %s434_s7 = int_to_ptr.vmem [resolvable:$true] %s433_s7 }
  0x33   :  { %232 = vmatpush2.msra.mxu0 %v114_v34  ;;  %303 = vmatpush2.msra.mxu1 %v116_v35  ;;  %v106_v42 = vld [vmem:[%s998_s1 + $0x2a0] sm:$0xff]  ;;  %v108_v43 = vld [vmem:[%s998_s1 + $0x2b0] sm:$0xff]  ;;  %v103_v44 = vld [vmem:[%s998_s1 + $0x288] sm:$0xff]  ;;  %s498_s8 = scalar_lea.vmem %s434_s7, 32  ;;  %p503_p1 = scmp.lt.s32.totalorder %s434_s7, %s434_s7 }
  0x34   :  { %233 = vmatprep.subr.mxu0 %v111_v36  ;;  %304 = vmatprep.subr.mxu1 %v113_v37  ;;  %v105_v45 = vld [vmem:[%s998_s1 + $0x298] sm:$0xff]  ;;  %v102_v46 = vld [vmem:[%s998_s1 + $0x280] sm:$0xff]  ;;  %v104_v47 = vld [vmem:[%s998_s1 + $0x290] sm:$0xff]  ;;  %v154_v21 = vsub.s32 0, %v153_v20  ;;  %v162_v22 = vsub.s32 2, %v153_v20  ;;  %v158_v24 = vsub.s32 1, %v153_v20  ;;  %p499_p0 = scmp.ne.s32.totalorder %s434_s7, %s498_s8  ;;  %p504_p2 = scmp.lt.s32.totalorder %s498_s8, %s498_s8 }
  0x35   :  { %234 = vmatpush2.msra.mxu0 %v110_v38  ;;  %305 = vmatpush2.msra.mxu1 %v112_v39  ;;  %v99_v48 = vld [vmem:[%s998_s1 + $0x268] sm:$0xff]  ;;  %v101_v49 = vld [vmem:[%s998_s1 + $0x278] sm:$0xff]  ;;  %v98_v50 = vld [vmem:[%s998_s1 + $0x260] sm:$0xff]  ;;  %v166_v25 = vsub.s32 3, %v153_v20 }
  0x36   :  { %235 = vmatprep.subr.mxu0 %v107_v40  ;;  %306 = vmatprep.subr.mxu1 %v109_v41  ;;  %v100_v51 = vld [vmem:[%s998_s1 + $0x270] sm:$0xff]  ;;  %v95_v52 = vld [vmem:[%s998_s1 + $0x248] sm:$0xff]  ;;  %v97_v53 = vld [vmem:[%s998_s1 + $0x258] sm:$0xff]  ;;  %p505_p3 = por %p504_p2, %p503_p1 }
  0x37   :  { %236 = vmatpush2.msra.mxu0 %v106_v42  ;;  %307 = vmatpush2.msra.mxu1 %v108_v43  ;;  %v94_v54 = vld [vmem:[%s998_s1 + $0x240] sm:$0xff]  ;;  %v96_v55 = vld [vmem:[%s998_s1 + $0x250] sm:$0xff]  ;;  %v91_v57 = vld [vmem:[%s998_s1 + $0x228] sm:$0xff] }
  0x38   :  { %237 = vmatprep.subr.mxu0 %v103_v44  ;;  %308 = vmatprep.subr.mxu1 %v105_v45  ;;  %v441_v56 = vld.sshfl [vmem:[%s997_s0] sm:$0x33 pattern:$0x76325410]  ;;  %v93_v58 = vld [vmem:[%s998_s1 + $0x238] sm:$0xff]  ;;  %v92_v60 = vld [vmem:[%s998_s1 + $0x230] sm:$0xff]  ;;  %p506_p4 = pnand %p505_p3, %p499_p0 }
  0x39   :  { %238 = vmatpush2.msra.mxu0 %v102_v46  ;;  %309 = vmatpush2.msra.mxu1 %v104_v47  ;;  %v90_v59 = vld [vmem:[%s998_s1 + $0x220] sm:$0xff]  ;;  %v87_v61 = vld [vmem:[%s998_s1 + $0x208] sm:$0xff]  ;;  %v89_v62 = vld [vmem:[%s998_s1 + $0x218] sm:$0xff]  ;;  %v180_v63 = vcombine.high %v441_v56, %v441_v56 }
  0x3a   :  { %239 = vmatprep.subr.mxu0 %v99_v48  ;;  %310 = vmatprep.subr.mxu1 %v101_v49  ;;  %v86_v0 = vld [vmem:[%s998_s1 + $0x200] sm:$0xff]  ;;  %v88_v1 = vld [vmem:[%s998_s1 + $0x210] sm:$0xff]  ;;  %v347_v2 = vld [vmem:[%s1000_s3 + $0x78] sm:$0xff] }
  0x3b   :  { %240 = vmatpush2.msra.mxu0 %v98_v50  ;;  %311 = vmatpush2.msra.mxu1 %v100_v51  ;;  %v346_v4 = vld [vmem:[%s1000_s3 + $0x70] sm:$0xff]  ;;  %v345_v5 = vld [vmem:[%s1000_s3 + $0x68] sm:$0xff]  ;;  %v344_v6 = vld [vmem:[%s1000_s3 + $0x60] sm:$0xff] }
  0x3c   :  { %241 = vmatprep.subr.mxu0 %v95_v52  ;;  %312 = vmatprep.subr.mxu1 %v97_v53  ;;  %v343_v7 = vld [vmem:[%s1000_s3 + $0x58] sm:$0xff]  ;;  %v342_v8 = vld [vmem:[%s1000_s3 + $0x50] sm:$0xff]  ;;  %v341_v9 = vld [vmem:[%s1000_s3 + $0x48] sm:$0xff] }
  0x3d   :  { %242 = vmatpush2.msra.mxu0 %v94_v54  ;;  %313 = vmatpush2.msra.mxu1 %v96_v55  ;;  %v340_v10 = vld [vmem:[%s1000_s3 + $0x40] sm:$0xff]  ;;  %v339_v11 = vld [vmem:[%s1000_s3 + $0x38] sm:$0xff]  ;;  %v338_v12 = vld [vmem:[%s1000_s3 + $0x30] sm:$0xff] }
  0x3e   :  { %243 = vmatprep.subr.mxu0 %v91_v57  ;;  %314 = vmatprep.subr.mxu1 %v93_v58  ;;  %v337_v13 = vld [vmem:[%s1000_s3 + $0x28] sm:$0xff]  ;;  %v336_v14 = vld [vmem:[%s1000_s3 + $0x20] sm:$0xff]  ;;  %v335_v15 = vld [vmem:[%s1000_s3 + $0x18] sm:$0xff] }
  0x3f   :  { %244 = vmatpush2.msra.mxu0 %v90_v59  ;;  %315 = vmatpush2.msra.mxu1 %v92_v60  ;;  %v334_v16 = vld [vmem:[%s1000_s3 + $0x10] sm:$0xff]  ;;  %v333_v17 = vld [vmem:[%s1000_s3 + $0x8] sm:$0xff]  ;;  %v332_v18 = vld [vmem:[%s1000_s3] sm:$0xff] }
  0x40   :  { %245 = vmatprep.subr.mxu0 %v87_v61  ;;  %316 = vmatprep.subr.mxu1 %v89_v62  ;;  %v150_v23 = vld [vmem:[%s999_s2] sm:$0xf] }
  0x41   :  { %246 = vmatpush2.msra.mxu0 %v86_v0  ;;  %247 = vmatprep.mubr.f32.mxu0 %v180_v63  ;;  %v155_v26 = vrot.slane %v150_v23, %v154_v21  ;;  %v163_v27 = vrot.slane %v150_v23, %v162_v22  ;;  %v159_v28 = vrot.slane %v150_v23, %v158_v24  ;;  %v442_v45 = vld [vmem:[%s1001_s4] ss:$0 sm:$0xff] }
  0x42   :  { %317 = vmatpush2.msra.mxu1 %v88_v1  ;;  %318 = vmatprep.mubr.f32.mxu1 %v180_v63  ;;  %v167_v29 = vrot.slane %v150_v23, %v166_v25 }
  0x43   :  { %248 = vmatmul.mubr.f32.vlgmr.msra.gmra.mxu0 %v441_v56  ;;  %319 = vmatmul.mubr.f32.vlgmr.msra.gmra.mxu1 %v441_v56 }
  0x44   :  { %460 = vmatprep.subr.mxu0 %v520_v3  ;;  %492 = vmatprep.mubr.msk.f32.mxu0 %vm521_vm0, %v520_v3 }
  0x45   :  { %461 = vmatpush3.msra.mxu0 %v347_v2 }
  0x46   :  { %462 = vmatprep.subr.mxu0 %v520_v3 }
  0x47   :  { %463 = vmatpush3.msra.mxu0 %v346_v4 }
  0x48   :  { %464 = vmatprep.subr.mxu0 %v520_v3 }
  0x49   :  { %465 = vmatpush3.msra.mxu0 %v345_v5 }
  0x4a   :  { %466 = vmatprep.subr.mxu0 %v520_v3 }
  0x4b   :  { %467 = vmatpush3.msra.mxu0 %v344_v6 }
  0x4c   :  { %468 = vmatprep.subr.mxu0 %v520_v3 }
  0x4d   :  { %469 = vmatpush3.msra.mxu0 %v343_v7 }
  0x4e   :  { %470 = vmatprep.subr.mxu0 %v520_v3 }
  0x4f   :  { %471 = vmatpush3.msra.mxu0 %v342_v8 }
  0x50   :  { %472 = vmatprep.subr.mxu0 %v520_v3 }
  0x51   :  { %473 = vmatpush3.msra.mxu0 %v341_v9 }
  0x52   :  { %474 = vmatprep.subr.mxu0 %v520_v3 }
  0x53   :  { %475 = vmatpush3.msra.mxu0 %v340_v10 }
  0x54   :  { %476 = vmatprep.subr.mxu0 %v520_v3 }
  0x55   :  { %477 = vmatpush3.msra.mxu0 %v339_v11 }
  0x56   :  { %478 = vmatprep.subr.mxu0 %v520_v3 }
  0x57   :  { %479 = vmatpush3.msra.mxu0 %v338_v12 }
  0x58   :  { %480 = vmatprep.subr.mxu0 %v520_v3 }
  0x59   :  { %481 = vmatpush3.msra.mxu0 %v337_v13 }
  0x5a   :  { %482 = vmatprep.subr.mxu0 %v520_v3 }
  0x5b   :  { %483 = vmatpush3.msra.mxu0 %v336_v14 }
  0x5c   :  { %484 = vmatprep.subr.mxu0 %v520_v3 }
  0x5d   :  { %485 = vmatpush3.msra.mxu0 %v335_v15 }
  0x5e   :  { %486 = vmatprep.subr.mxu0 %v520_v3 }
  0x5f   :  { %487 = vmatpush3.msra.mxu0 %v334_v16 }
  0x60   :  { %488 = vmatprep.subr.mxu0 %v520_v3 }
  0x61   :  { %489 = vmatpush3.msra.mxu0 %v333_v17 }
  0x62   :  { %490 = vmatprep.subr.mxu0 %v520_v3 }
  0x63   :  { %491 = vmatpush3.msra.mxu0 %v332_v18 }
 0x103   :  { %v249_v30 = vpop.f32.mrf.mxu0  ;;  %v320_v31 = vpop.f32.mrf.mxu1 }
 0x104   :  { %v250_v32 = vadd.f32 %v249_v30, %v155_v26  ;;  %v321_v33 = vadd.f32 %v320_v31, %v163_v27 }
 0x105   :  { %v251_v34 = vpop.f32.mrf.mxu0  ;;  %v322_v35 = vpop.f32.mrf.mxu1 }
 0x106   :  { %v252_v36 = vadd.f32 %v251_v34, %v159_v28  ;;  %v323_v37 = vadd.f32 %v322_v35, %v167_v29  ;;  %v325_v38 = vmax.f32 %v250_v32, 0.0  ;;  %v327_v39 = vmax.f32 %v321_v33, 0.0 }
 0x108   :  { %v326_v40 = vmax.f32 %v252_v36, 0.0  ;;  %v328_v41 = vmax.f32 %v323_v37, 0.0 }
 0x10a   :  { %v329_v42 = vmax.f32 %v325_v38, %v326_v40  ;;  %v330_v43 = vmax.f32 %v327_v39, %v328_v41 }
 0x10c   :  { %v331_v44 = vmax.f32 %v329_v42, %v330_v43 }
 0x10e   :  { %493 = vmatmul.mubr.f32.vlgmr.msra.gmra.mxu0 %v331_v44 }
 0x1ce   :  { %v421_v46 = vpop.f32.mrf.mxu0 }
 0x1cf   :  { %v422_v47 = vadd.f32 %v442_v45, %v421_v46 }
 0x1d0   :  { %v494_v48 = vpop.f32.mrf.mxu0 }
 0x1d1   :  { %v425_v49 = vmax.f32 %v422_v47, 0.0 }
 0x1d3   :  { %426 = vst [vmem:[#allocation2] sm:$0x3] %v425_v49 }
 0x1d4   :  { %509 = shalt.err (!%p506_p4)
}
 0x1d5   :  { %436 = dma.vmem_to_hbm [thread:$0]  %s434_s7, 32, %s1002_s5, [#allocation3]  }
 0x1d6   :  { %518 = dma.done.wait [#allocation3], 32  }
 0x1d7   :  { %519 = vsyncadd [#allocation3], 4294967264 }
 0x1d8   :  { %440 = vsyncpa [#allocation3], 1 }

</bundles_post_ra>
